<compile_context>
chip_gen: v7x
topology: tpu7x:2x2x1
jax: 0.10.0
libtpu: 0.0.40
codegen_flags: <defaults>
</compile_context>

<pallas_src>
import jax
import jax.numpy as jnp
from jax.experimental import pallas as pl
from jax.experimental.pallas import tpu as pltpu


def _round_up(n, m):
    return (n + m - 1) // m * m


# ---------------------------------------------------------------------------
# Kernel: one batch tile; all (folded, padded) weights resident in VMEM.
# ---------------------------------------------------------------------------
def _mlp_kernel(x_ref, w1_ref, b1_ref, w2_ref, b2_ref, w3_ref, b3_ref,
                w4_ref, b4_ref, o_ref):
    # fc1 (input_bn & bn1 folded in) -> ReLU      (dropout == identity, eval mode)
    h = jnp.dot(x_ref[...], w1_ref[...],
                preferred_element_type=jnp.float32) + b1_ref[...]
    h = jnp.maximum(h, 0.0)
    # fc2 (bn2 folded in) -> ReLU
    h = jnp.dot(h, w2_ref[...],
                preferred_element_type=jnp.float32) + b2_ref[...]
    h = jnp.maximum(h, 0.0)
    # fc3 (bn3 folded in) -> ReLU
    h = jnp.dot(h, w3_ref[...],
                preferred_element_type=jnp.float32) + b3_ref[...]
    h = jnp.maximum(h, 0.0)
    # fc4 (lane-dense 128-wide padded output; real classes are the first columns)
    o_ref[...] = jnp.dot(h, w4_ref[...],
                         preferred_element_type=jnp.float32) + b4_ref[...]


# ---------------------------------------------------------------------------
# Wrapper: batch tiling + padding + pallas_call.
# ---------------------------------------------------------------------------
def urticaria_forward(x, fp, *, num_classes, block_batch=512):
    """x: (B, input_size) float32; fp: folded & padded params from fold_and_pad_params."""
    B, Din = x.shape
    D0 = fp["w1"].shape[0]
    H1 = fp["w1"].shape[1]
    H2 = fp["w2"].shape[1]
    H3 = fp["w3"].shape[1]
    C = fp["w4"].shape[1]

    # Batch tile: multiple of 8 sublanes, capped (conservative for v7x's 64 MiB VMEM).
    tm = min(block_batch, _round_up(B, 8))
    Bp = _round_up(B, tm)

    # Pad input (zero feature/batch padding is absorbed by zero weight rows),
    # cast to bf16 for the dominant (B, D0) x (D0, H1) matmul.
    xp = jnp.zeros((Bp, D0), jnp.float32).at[:B, :Din].set(x)
    xp = xp.astype(jnp.bfloat16)

    resident = lambda i: (0, 0)  # weights/biases keep the same block every step

    out = pl.pallas_call(
        _mlp_kernel,
        out_shape=jax.ShapeDtypeStruct((Bp, C), jnp.float32),
        grid=(Bp // tm,),
        in_specs=[
            pl.BlockSpec((tm, D0), lambda i: (i, 0)),   # x: streamed per batch tile
            pl.BlockSpec((D0, H1), resident),
            pl.BlockSpec((1, H1), resident),
            pl.BlockSpec((H1, H2), resident),
            pl.BlockSpec((1, H2), resident),
            pl.BlockSpec((H2, H3), resident),
            pl.BlockSpec((1, H3), resident),
            pl.BlockSpec((H3, C), resident),
            pl.BlockSpec((1, C), resident),
        ],
        out_specs=pl.BlockSpec((tm, C), lambda i: (i, 0)),
        compiler_params=pltpu.CompilerParams(
            dimension_semantics=("parallel",),
            vmem_limit_bytes=32 << 20,
        ),
    )(xp, fp["w1"], fp["b1"], fp["w2"], fp["b2"],
      fp["w3"], fp["b3"], fp["w4"], fp["b4"])

    return out[:B, :num_classes]


# ---------------------------------------------------------------------------
# Glue: BN folding + lane padding.
# ---------------------------------------------------------------------------
def _bn_fold(gamma, beta, mean, var, eps=1e-5):
    """BN(x) = (x - mean)/sqrt(var+eps)*gamma + beta  ->  x*scale + shift."""
    s = gamma / jnp.sqrt(var + eps)
    t = beta - mean * s
    return s, t


def fold_and_pad_params(raw, *, lane=128):
    """Fold all BN affines into the Linear weights/biases, zero-pad feature dims
    to multiples of `lane`, and cast w1 (the streamed weight) to bf16."""
    s0, t0 = _bn_fold(*raw["bn0"])
    s1, t1 = _bn_fold(*raw["bn1"])
    s2, t2 = _bn_fold(*raw["bn2"])
    s3, t3 = _bn_fold(*raw["bn3"])

    # layer 1:  BN1(BN0(x) @ W1 + b1)  ==  x @ (s0[:,None]*W1*s1) + ((t0@W1 + b1)*s1 + t1)
    w1 = raw["w1"] * s0[:, None] * s1[None, :]
    b1 = (t0 @ raw["w1"] + raw["b1"]) * s1 + t1
    # layers 2,3:  BN(h @ W + b)  ==  h @ (W*s) + (b*s + t)
    w2 = raw["w2"] * s2[None, :]
    b2 = raw["b2"] * s2 + t2
    w3 = raw["w3"] * s3[None, :]
    b3 = raw["b3"] * s3 + t3
    w4 = raw["w4"]
    b4 = raw["b4"]

    def pad_mat(w, r, c):
        return jnp.zeros((r, c), jnp.float32).at[:w.shape[0], :w.shape[1]].set(w)

    def pad_vec(b, c):
        return jnp.zeros((1, c), jnp.float32).at[0, :b.shape[0]].set(b)

    D0 = _round_up(w1.shape[0], lane)
    H1 = _round_up(w1.shape[1], lane)
    H2 = _round_up(w2.shape[1], lane)
    H3 = _round_up(w3.shape[1], lane)
    C = _round_up(w4.shape[1], lane)

    return {
        "w1": pad_mat(w1, D0, H1).astype(jnp.bfloat16),
        "b1": pad_vec(b1, H1),
        "w2": pad_mat(w2, H1, H2),
        "b2": pad_vec(b2, H2),
        "w3": pad_mat(w3, H2, H3),
        "b3": pad_vec(b3, H3),
        "w4": pad_mat(w4, H3, C),
        "b4": pad_vec(b4, C),
    }


# ---------------------------------------------------------------------------
# Synthetic parameters mirroring the PyTorch module (weights pre-transposed
# to (in_features, out_features); BN given as (gamma, beta, mean, var)).
# ---------------------------------------------------------------------------
def init_raw_params(key, input_size, hidden_size, num_classes):
    if input_size > 100000:
        hidden_size = 512
    dims = [(input_size, hidden_size),
            (hidden_size, hidden_size // 2),
            (hidden_size // 2, hidden_size // 4),
            (hidden_size // 4, num_classes)]
    bn_sizes = [input_size, hidden_size, hidden_size // 2, hidden_size // 4]

    keys = jax.random.split(key, 4 * len(bn_sizes) + 2 * len(dims))
    raw = {}
    k = 0
    for i, n in enumerate(bn_sizes):
        gamma = 1.0 + 0.1 * jax.random.normal(keys[k], (n,), jnp.float32)
        beta = 0.05 * jax.random.normal(keys[k + 1], (n,), jnp.float32)
        mean = 0.1 * jax.random.normal(keys[k + 2], (n,), jnp.float32)
        var = 1.0 + 0.1 * jax.random.uniform(keys[k + 3], (n,), jnp.float32)
        raw[f"bn{i}"] = (gamma, beta, mean, var)
        k += 4
    for li, (din, dout) in enumerate(dims, start=1):
        bound = 1.0 / float(din) ** 0.5
        raw[f"w{li}"] = jax.random.uniform(keys[k], (din, dout), jnp.float32,
                                           -bound, bound)
        raw[f"b{li}"] = jax.random.uniform(keys[k + 1], (dout,), jnp.float32,
                                           -bound, bound)
        k += 2
    return raw


# ---------------------------------------------------------------------------
# References.
# ---------------------------------------------------------------------------
def reference_forward_f32(x, raw):
    """Eval-mode reference of the original module, plain float32 JAX."""
    def bn(h, p):
        g, b, m, v = p
        return (h - m) / jnp.sqrt(v + 1e-5) * g + b
    h = bn(x, raw["bn0"])
    h = jnp.maximum(bn(h @ raw["w1"] + raw["b1"], raw["bn1"]), 0.0)
    h = jnp.maximum(bn(h @ raw["w2"] + raw["b2"], raw["bn2"]), 0.0)
    h = jnp.maximum(bn(h @ raw["w3"] + raw["b3"], raw["bn3"]), 0.0)
    return h @ raw["w4"] + raw["b4"]


def reference_forward_folded(x, fp, num_classes):
    """Plain-JAX replica of the exact kernel numerics (folded BN, bf16 first matmul)."""
    D0 = fp["w1"].shape[0]
    xp = jnp.zeros((x.shape[0], D0), jnp.float32).at[:, :x.shape[1]].set(x)
    h = jnp.dot(xp.astype(jnp.bfloat16), fp["w1"],
                preferred_element_type=jnp.float32) + fp["b1"]
    h = jnp.maximum(h, 0.0)
    h = jnp.maximum(h @ fp["w2"] + fp["b2"], 0.0)
    h = jnp.maximum(h @ fp["w3"] + fp["b3"], 0.0)
    return (h @ fp["w4"] + fp["b4"])[:, :num_classes]


if __name__ == "__main__":
    # Small shapes consistent with the module: (batch, input_size) -> (batch, num_classes)
    batch = 8
    input_size = 512      # <= 100000, so hidden_size stays as given
    hidden_size = 32
    num_classes = 2

    key = jax.random.PRNGKey(0)
    kx, kp = jax.random.split(key)
    x = jax.random.normal(kx, (batch, input_size), jnp.float32)

    raw = init_raw_params(kp, input_size, hidden_size, num_classes)
    fp = fold_and_pad_params(raw)

    out = urticaria_forward(x, fp, num_classes=num_classes)
    out = jax.block_until_ready(out)
    assert out.shape == (batch, num_classes)

    # Exact-numerics check (same folded params, same bf16 first matmul).
    ref_kernel = reference_forward_folded(x, fp, num_classes)
    assert jnp.allclose(out, ref_kernel, atol=1e-3, rtol=1e-3), \
        float(jnp.max(jnp.abs(out - ref_kernel)))

    # Semantics check against the original (unfolded, full-f32) eval-mode forward.
    ref_f32 = reference_forward_f32(x, raw)
    assert jnp.allclose(out, ref_f32, atol=5e-2, rtol=5e-2), \
        float(jnp.max(jnp.abs(out - ref_f32)))

    print("KERNEL_OK")
</pallas_src>

<mosaic_0001>
module attributes {stable_mosaic.version = 11 : i64} {
  func.func @_mlp_kernel(%arg0: i32, %arg1: memref<8x512xbf16, #tpu.memory_space<vmem>>, %arg2: memref<512x128xbf16, #tpu.memory_space<vmem>>, %arg3: memref<1x128xf32, #tpu.memory_space<vmem>>, %arg4: memref<128x128xf32, #tpu.memory_space<vmem>>, %arg5: memref<1x128xf32, #tpu.memory_space<vmem>>, %arg6: memref<128x128xf32, #tpu.memory_space<vmem>>, %arg7: memref<1x128xf32, #tpu.memory_space<vmem>>, %arg8: memref<128x128xf32, #tpu.memory_space<vmem>>, %arg9: memref<1x128xf32, #tpu.memory_space<vmem>>, %arg10: memref<8x128xf32, #tpu.memory_space<vmem>>) attributes {dimension_semantics = [#tpu.dimension_semantics<parallel>], iteration_bounds = array<i64: 1>, scalar_prefetch = 0 : i64, scratch_operands = 0 : i64, tpu.core_type = #tpu.core_type<tc>, window_params = [{transform_indices = @transform_0, window_bounds = array<i64: 8, 512>}, {pipeline_mode = #tpu.pipeline_mode<synchronous>, transform_indices = @transform_1, window_bounds = array<i64: 512, 128>}, {pipeline_mode = #tpu.pipeline_mode<synchronous>, transform_indices = @transform_2, window_bounds = array<i64: 1, 128>}, {pipeline_mode = #tpu.pipeline_mode<synchronous>, transform_indices = @transform_3, window_bounds = array<i64: 128, 128>}, {pipeline_mode = #tpu.pipeline_mode<synchronous>, transform_indices = @transform_4, window_bounds = array<i64: 1, 128>}, {pipeline_mode = #tpu.pipeline_mode<synchronous>, transform_indices = @transform_5, window_bounds = array<i64: 128, 128>}, {pipeline_mode = #tpu.pipeline_mode<synchronous>, transform_indices = @transform_6, window_bounds = array<i64: 1, 128>}, {pipeline_mode = #tpu.pipeline_mode<synchronous>, transform_indices = @transform_7, window_bounds = array<i64: 128, 128>}, {pipeline_mode = #tpu.pipeline_mode<synchronous>, transform_indices = @transform_8, window_bounds = array<i64: 1, 128>}, {transform_indices = @transform_9, window_bounds = array<i64: 8, 128>}]} {
    %c0 = arith.constant 0 : index
    %c0_0 = arith.constant 0 : index
    %0 = vector.load %arg1[%c0, %c0_0] : memref<8x512xbf16, #tpu.memory_space<vmem>>, vector<8x512xbf16>
    %c0_1 = arith.constant 0 : index
    %c0_2 = arith.constant 0 : index
    %1 = vector.load %arg2[%c0_1, %c0_2] : memref<512x128xbf16, #tpu.memory_space<vmem>>, vector<512x128xbf16>
    %cst = arith.constant dense<0.000000e+00> : vector<8x128xf32>
    %2 = tpu.matmul %0, %1, %cst {dimension_numbers = #tpu.dot_dimension_numbers<[1], [0], [0], [1], [0, 0, 1, 1], [], []>} : vector<8x512xbf16>, vector<512x128xbf16>, vector<8x128xf32> -> vector<8x128xf32>
    %c0_3 = arith.constant 0 : index
    %c0_4 = arith.constant 0 : index
    %3 = vector.load %arg3[%c0_3, %c0_4] : memref<1x128xf32, #tpu.memory_space<vmem>>, vector<1x128xf32>
    %4 = vector.broadcast %3 : vector<1x128xf32> to vector<8x128xf32>
    %5 = arith.addf %2, %4 : vector<8x128xf32>
    %cst_5 = arith.constant 0.000000e+00 : f32
    %6 = vector.broadcast %cst_5 : f32 to vector<8x128xf32>
    %7 = arith.maximumf %5, %6 : vector<8x128xf32>
    %c0_6 = arith.constant 0 : index
    %c0_7 = arith.constant 0 : index
    %8 = vector.load %arg4[%c0_6, %c0_7] : memref<128x128xf32, #tpu.memory_space<vmem>>, vector<128x128xf32>
    %cst_8 = arith.constant dense<0.000000e+00> : vector<8x128xf32>
    %9 = tpu.matmul %7, %8, %cst_8 {dimension_numbers = #tpu.dot_dimension_numbers<[1], [0], [0], [1], [0, 0, 1, 1], [], []>} : vector<8x128xf32>, vector<128x128xf32>, vector<8x128xf32> -> vector<8x128xf32>
    %c0_9 = arith.constant 0 : index
    %c0_10 = arith.constant 0 : index
    %10 = vector.load %arg5[%c0_9, %c0_10] : memref<1x128xf32, #tpu.memory_space<vmem>>, vector<1x128xf32>
    %11 = vector.broadcast %10 : vector<1x128xf32> to vector<8x128xf32>
    %12 = arith.addf %9, %11 : vector<8x128xf32>
    %cst_11 = arith.constant 0.000000e+00 : f32
    %13 = vector.broadcast %cst_11 : f32 to vector<8x128xf32>
    %14 = arith.maximumf %12, %13 : vector<8x128xf32>
    %c0_12 = arith.constant 0 : index
    %c0_13 = arith.constant 0 : index
    %15 = vector.load %arg6[%c0_12, %c0_13] : memref<128x128xf32, #tpu.memory_space<vmem>>, vector<128x128xf32>
    %cst_14 = arith.constant dense<0.000000e+00> : vector<8x128xf32>
    %16 = tpu.matmul %14, %15, %cst_14 {dimension_numbers = #tpu.dot_dimension_numbers<[1], [0], [0], [1], [0, 0, 1, 1], [], []>} : vector<8x128xf32>, vector<128x128xf32>, vector<8x128xf32> -> vector<8x128xf32>
    %c0_15 = arith.constant 0 : index
    %c0_16 = arith.constant 0 : index
    %17 = vector.load %arg7[%c0_15, %c0_16] : memref<1x128xf32, #tpu.memory_space<vmem>>, vector<1x128xf32>
    %18 = vector.broadcast %17 : vector<1x128xf32> to vector<8x128xf32>
    %19 = arith.addf %16, %18 : vector<8x128xf32>
    %cst_17 = arith.constant 0.000000e+00 : f32
    %20 = vector.broadcast %cst_17 : f32 to vector<8x128xf32>
    %21 = arith.maximumf %19, %20 : vector<8x128xf32>
    %c0_18 = arith.constant 0 : index
    %c0_19 = arith.constant 0 : index
    %22 = vector.load %arg8[%c0_18, %c0_19] : memref<128x128xf32, #tpu.memory_space<vmem>>, vector<128x128xf32>
    %cst_20 = arith.constant dense<0.000000e+00> : vector<8x128xf32>
    %23 = tpu.matmul %21, %22, %cst_20 {dimension_numbers = #tpu.dot_dimension_numbers<[1], [0], [0], [1], [0, 0, 1, 1], [], []>} : vector<8x128xf32>, vector<128x128xf32>, vector<8x128xf32> -> vector<8x128xf32>
    %c0_21 = arith.constant 0 : index
    %c0_22 = arith.constant 0 : index
    %24 = vector.load %arg9[%c0_21, %c0_22] : memref<1x128xf32, #tpu.memory_space<vmem>>, vector<1x128xf32>
    %25 = vector.broadcast %24 : vector<1x128xf32> to vector<8x128xf32>
    %26 = arith.addf %23, %25 : vector<8x128xf32>
    %c0_23 = arith.constant 0 : index
    %c0_24 = arith.constant 0 : index
    %27 = vector.load %arg10[%c0_23, %c0_24] : memref<8x128xf32, #tpu.memory_space<vmem>>, vector<8x128xf32>
    tpu.vector_store %arg10[%c0_23, %c0_24], %26 {strides = array<i32>} : memref<8x128xf32, #tpu.memory_space<vmem>>, vector<8x128xf32>,
    return
  }
  func.func @transform_0(%arg0: i32) -> (i32, i32) {
    %c0_i32 = arith.constant 0 : i32
    %c0_i32_0 = arith.constant 0 : i32
    return %arg0, %c0_i32 : i32, i32
  }
  func.func @transform_1(%arg0: i32) -> (i32, i32) {
    %c0_i32 = arith.constant 0 : i32
    %c0_i32_0 = arith.constant 0 : i32
    %c0_i32_1 = arith.constant 0 : i32
    return %c0_i32, %c0_i32_0 : i32, i32
  }
  func.func @transform_2(%arg0: i32) -> (i32, i32) {
    %c0_i32 = arith.constant 0 : i32
    %c0_i32_0 = arith.constant 0 : i32
    %c0_i32_1 = arith.constant 0 : i32
    return %c0_i32, %c0_i32_0 : i32, i32
  }
  func.func @transform_3(%arg0: i32) -> (i32, i32) {
    %c0_i32 = arith.constant 0 : i32
    %c0_i32_0 = arith.constant 0 : i32
    %c0_i32_1 = arith.constant 0 : i32
    return %c0_i32, %c0_i32_0 : i32, i32
  }
  func.func @transform_4(%arg0: i32) -> (i32, i32) {
    %c0_i32 = arith.constant 0 : i32
    %c0_i32_0 = arith.constant 0 : i32
    %c0_i32_1 = arith.constant 0 : i32
    return %c0_i32, %c0_i32_0 : i32, i32
  }
  func.func @transform_5(%arg0: i32) -> (i32, i32) {
    %c0_i32 = arith.constant 0 : i32
    %c0_i32_0 = arith.constant 0 : i32
    %c0_i32_1 = arith.constant 0 : i32
    return %c0_i32, %c0_i32_0 : i32, i32
  }
  func.func @transform_6(%arg0: i32) -> (i32, i32) {
    %c0_i32 = arith.constant 0 : i32
    %c0_i32_0 = arith.constant 0 : i32
    %c0_i32_1 = arith.constant 0 : i32
    return %c0_i32, %c0_i32_0 : i32, i32
  }
  func.func @transform_7(%arg0: i32) -> (i32, i32) {
    %c0_i32 = arith.constant 0 : i32
    %c0_i32_0 = arith.constant 0 : i32
    %c0_i32_1 = arith.constant 0 : i32
    return %c0_i32, %c0_i32_0 : i32, i32
  }
  func.func @transform_8(%arg0: i32) -> (i32, i32) {
    %c0_i32 = arith.constant 0 : i32
    %c0_i32_0 = arith.constant 0 : i32
    %c0_i32_1 = arith.constant 0 : i32
    return %c0_i32, %c0_i32_0 : i32, i32
  }
  func.func @transform_9(%arg0: i32) -> (i32, i32) {
    %c0_i32 = arith.constant 0 : i32
    %c0_i32_0 = arith.constant 0 : i32
    return %arg0, %c0_i32 : i32, i32
  }
}

</mosaic_0001>

<bundles_post_ra>
// kernel: tpu_custom_call.1
= control target key start
LH: loop header
LB: loop body
LE: loop exit
PB: predicated region body
PF: predicated region fallthrough
CT: control target
= control target key end

     0   :  { %14 = vsyncpa [#allocation3], 0  ;;  %s1443_s0 = inlined_call_operand.hbm [shape: bf16[8,512], index: 0, kind: input, shape index: {}]   ;;  %s1444_s1 = inlined_call_operand.hbm [shape: bf16[512,128], index: 1, kind: input, shape index: {}]   ;;  %s1445_s2 = inlined_call_operand.vmem [shape: f32[1,128], index: 2, kind: input, shape index: {}]   ;;  %s1446_s3 = inlined_call_operand.hbm [shape: f32[128,128], index: 3, kind: input, shape index: {}]   ;;  %s1447_s4 = inlined_call_operand.vmem [shape: f32[1,128], index: 4, kind: input, shape index: {}]   ;;  %s1448_s5 = inlined_call_operand.hbm [shape: f32[128,128], index: 5, kind: input, shape index: {}]   ;;  %s1449_s6 = inlined_call_operand.vmem [shape: f32[1,128], index: 6, kind: input, shape index: {}]   ;;  %s1450_s7 = inlined_call_operand.hbm [shape: f32[128,128], index: 7, kind: input, shape index: {}]   ;;  %s1451_s8 = inlined_call_operand.vmem [shape: f32[1,128], index: 8, kind: input, shape index: {}]   ;;  %s1452_s9 = inlined_call_operand.hbm [shape: f32[8,128], index: 9, kind: output, shape index: {}]  }
   0x1   :  { %15 = vsyncpa [#allocation6], 0 }
   0x2   :  { %16 = vsyncpa [#allocation9], 0 }
   0x3   :  { %17 = vsyncpa [#allocation4], 0  ;;  %s1260_s30 = smov [#allocation5]   ;;  %s1120_s13 = scalar_lea.hbm %s1444_s1, 4096 }
   0x4   :  { %s33_s10 = sshll.u32 %s1260_s30, 4  ;;  %p1121_p0 = scmp.ne.s32.totalorder %s1444_s1, %s1120_s13  ;;  %s34_s10 = int_to_ptr.vmem [resolvable:$true] %s33_s10 }
   0x5   :  { %p1124_p1 = scmp.lt.u32.totalorder %s1120_s13, %s1444_s1 }
   0x7   :  { %p1126_p2 = pnand %p1124_p1, %p1121_p0 }
   0x9   :  { %1129 = shalt.err (!%p1126_p2)
}
   0xa   :  { %s1130_s18 = scalar_lea.vmem %s34_s10, 4096  ;;  %p1135_p4 = scmp.lt.s32.totalorder %s34_s10, %s34_s10 }
   0xb   :  { %p1131_p3 = scmp.ne.s32.totalorder %s34_s10, %s1130_s18  ;;  %p1136_p5 = scmp.lt.s32.totalorder %s1130_s18, %s1130_s18 }
   0xd   :  { %p1137_p6 = por %p1136_p5, %p1135_p4 }
   0xf   :  { %p1138_p7 = pnand %p1137_p6, %p1131_p3 }
  0x11   :  { %1141 = shalt.err (!%p1138_p7)
}
  0x12   :  { %s1261_s19 = smov 64   ;;  %s1262_s20 = smov 4  }
  0x13   :  { %39 = dma.hbm_to_vmem [thread:$0]  %s1444_s1, 4096, %s34_s10, [#allocation6], %s1261_s19, %s1261_s19, %s1262_s20  }
  0x14   :  { %s1263_s23 = smov [#allocation8]   ;;  %s1264_s25 = smov [#allocation2]  }
  0x15   :  { %s61_s24 = sshll.u32 %s1263_s23, 4  ;;  %s24_s26 = sshll.u32 %s1264_s25, 4  ;;  %s62_s24 = int_to_ptr.vmem [resolvable:$true] %s61_s24  ;;  %s25_s26 = int_to_ptr.vmem [resolvable:$true] %s24_s26 }
  0x16   :  { %s1142_s29 = scalar_lea.hbm %s1448_s5, 2048 }
  0x17   :  { %p1143_p8 = scmp.ne.s32.totalorder %s1448_s5, %s1142_s29  ;;  %p1146_p9 = scmp.lt.u32.totalorder %s1142_s29, %s1448_s5 }
  0x19   :  { %p1148_p10 = pnand %p1146_p9, %p1143_p8 }
  0x1b   :  { %1151 = shalt.err (!%p1148_p10)
}
  0x1c   :  { %s1152_s1 = scalar_lea.vmem %s62_s24, 2048  ;;  %p1157_p12 = scmp.lt.s32.totalorder %s62_s24, %s62_s24 }
  0x1d   :  { %p1153_p11 = scmp.ne.s32.totalorder %s62_s24, %s1152_s1  ;;  %p1158_p13 = scmp.lt.s32.totalorder %s1152_s1, %s1152_s1 }
  0x1f   :  { %p1159_p0 = por %p1158_p13, %p1157_p12 }
  0x21   :  { %p1160_p1 = pnand %p1159_p0, %p1153_p11 }
  0x23   :  { %1163 = shalt.err (!%p1160_p1)
}
  0x24   :  { %s1265_s10 = smov 128   ;;  %s1266_s14 = smov 8  }
  0x25   :  { %67 = dma.hbm_to_vmem [thread:$0]  %s1448_s5, 2048, %s62_s24, [#allocation9], %s1265_s10, %s1265_s10, %s1266_s14  }
  0x26   :  { %s1164_s19 = scalar_lea.hbm %s1443_s0, 256 }
  0x27   :  { %p1165_p2 = scmp.ne.s32.totalorder %s1443_s0, %s1164_s19  ;;  %p1168_p3 = scmp.lt.u32.totalorder %s1164_s19, %s1443_s0 }
  0x29   :  { %p1170_p4 = pnand %p1168_p3, %p1165_p2 }
  0x2b   :  { %1173 = shalt.err (!%p1170_p4)
}
  0x2c   :  { %s1174_s25 = scalar_lea.vmem %s25_s26, 256  ;;  %p1179_p6 = scmp.lt.s32.totalorder %s25_s26, %s25_s26 }
  0x2d   :  { %p1175_p5 = scmp.ne.s32.totalorder %s25_s26, %s1174_s25  ;;  %p1180_p7 = scmp.lt.s32.totalorder %s1174_s25, %s1174_s25 }
  0x2f   :  { %p1181_p8 = por %p1180_p7, %p1179_p6 }
  0x31   :  { %p1182_p9 = pnand %p1181_p8, %p1175_p5 }
  0x33   :  { %1185 = shalt.err (!%p1182_p9)
}
  0x34   :  { %27 = dma.hbm_to_vmem [thread:$0]  %s1443_s0, 256, %s25_s26, [#allocation3]  }
  0x35   :  { %s1267_s27 = smov [#allocation7]   ;;  %s1268_s29 = smov [#allocation10]  }
  0x36   :  { %s47_s28 = sshll.u32 %s1267_s27, 4  ;;  %s75_s30 = sshll.u32 %s1268_s29, 4  ;;  %s48_s28 = int_to_ptr.vmem [resolvable:$true] %s47_s28  ;;  %s76_s30 = int_to_ptr.vmem [resolvable:$true] %s75_s30 }
  0x37   :  { %s1186_s13 = scalar_lea.hbm %s1446_s3, 2048 }
  0x38   :  { %p1187_p10 = scmp.ne.s32.totalorder %s1446_s3, %s1186_s13  ;;  %p1190_p11 = scmp.lt.u32.totalorder %s1186_s13, %s1446_s3 }
  0x3a   :  { %p1192_p12 = pnand %p1190_p11, %p1187_p10 }
  0x3c   :  { %1195 = shalt.err (!%p1192_p12)
}
  0x3d   :  { %s1196_s0 = scalar_lea.vmem %s48_s28, 2048  ;;  %p1201_p0 = scmp.lt.s32.totalorder %s48_s28, %s48_s28 }
  0x3e   :  { %p1197_p13 = scmp.ne.s32.totalorder %s48_s28, %s1196_s0  ;;  %p1202_p1 = scmp.lt.s32.totalorder %s1196_s0, %s1196_s0 }
  0x40   :  { %p1203_p2 = por %p1202_p1, %p1201_p0 }
  0x42   :  { %p1204_p3 = pnand %p1203_p2, %p1197_p13 }
  0x44   :  { %1207 = shalt.err (!%p1204_p3)
}
  0x45   :  { %53 = dma.hbm_to_vmem [thread:$0]  %s1446_s3, 2048, %s48_s28, [#allocation6], %s1265_s10, %s1265_s10, %s1266_s14  }
  0x46   :  { %s1208_s21 = scalar_lea.hbm %s1450_s7, 2048 }
  0x47   :  { %p1209_p4 = scmp.ne.s32.totalorder %s1450_s7, %s1208_s21  ;;  %p1212_p5 = scmp.lt.u32.totalorder %s1208_s21, %s1450_s7 }
  0x49   :  { %p1214_p6 = pnand %p1212_p5, %p1209_p4 }
  0x4b   :  { %1217 = shalt.err (!%p1214_p6)
}
  0x4c   :  { %s1218_s24 = scalar_lea.vmem %s76_s30, 2048  ;;  %p1223_p8 = scmp.lt.s32.totalorder %s76_s30, %s76_s30 }
  0x4d   :  { %p1219_p7 = scmp.ne.s32.totalorder %s76_s30, %s1218_s24  ;;  %p1224_p9 = scmp.lt.s32.totalorder %s1218_s24, %s1218_s24 }
  0x4f   :  { %p1225_p10 = por %p1224_p9, %p1223_p8 }
  0x51   :  { %p1226_p11 = pnand %p1225_p10, %p1219_p7 }
  0x53   :  { %1229 = shalt.err (!%p1226_p11)
}
  0x54   :  { %81 = dma.hbm_to_vmem [thread:$0]  %s1450_s7, 2048, %s76_s30, [#allocation9], %s1265_s10, %s1265_s10, %s1266_s14  }
  0x55   :  { %1252 = dma.done.wait [#allocation3], 256  }
  0x56   :  { %1253 = vsyncadd [#allocation3], 4294967040 }
  0x57   :  { %1254 = dma.done.wait [#allocation6], 6144  }
  0x58   :  { %1255 = vsyncadd [#allocation6], 4294961152 }
  0x59   :  { %1256 = dma.done.wait [#allocation9], 4096  }
  0x5a   :  { %1257 = vsyncadd [#allocation9], 4294963200  ;;  %v1084_v0 = vld [vmem:[#allocation5 + $0x40] sm:$0xff]   ;;  %v1088_v4 = vld [vmem:[#allocation5 + $0x48] sm:$0xff]   ;;  %v1269_v40 = vmov 0.0|0.0   ;;  %vm1270_vm0 = vmmov 0  }
  0x5b   :  { %v1085_v1 = vld [vmem:[#allocation5 + $0xc0] sm:$0xff]   ;;  %799 = vmatprep.subr.bf16.mxu0 %v1084_v0  ;;  %v1089_v5 = vld [vmem:[#allocation5 + $0xc8] sm:$0xff]   ;;  %v1092_v8 = vld [vmem:[#allocation5 + $0x50] sm:$0xff]   ;;  %v1271_v63 = vmov 0.0   ;;  %s1272_s11 = smov [#allocation11]  }
  0x5c   :  { %v1086_v2 = vld [vmem:[#allocation5] sm:$0xff]   ;;  %821 = vmatprep.subr.bf16.mxu1 %v1085_v1  ;;  %v1090_v6 = vld [vmem:[#allocation5 + $0x8] sm:$0xff]   ;;  %v1093_v9 = vld [vmem:[#allocation5 + $0xd0] sm:$0xff]   ;;  %s748_s12 = sshll.u32 %s1272_s11, 4  ;;  %s749_s12 = int_to_ptr.vmem [resolvable:$true] %s748_s12 }
  0x5d   :  { %v1087_v3 = vld [vmem:[#allocation5 + $0x80] sm:$0xff]   ;;  %800 = vmatpush3.bf16.msra.mxu0 %v1086_v2  ;;  %v1091_v7 = vld [vmem:[#allocation5 + $0x88] sm:$0xff]   ;;  %v1094_v10 = vld [vmem:[#allocation5 + $0x10] sm:$0xff]   ;;  %s1230_s13 = scalar_lea.vmem %s749_s12, 128  ;;  %p1235_p13 = scmp.lt.s32.totalorder %s749_s12, %s749_s12 }
  0x5e   :  { %822 = vmatpush3.bf16.msra.mxu1 %v1087_v3  ;;  %801 = vmatprep.subr.bf16.mxu0 %v1088_v4  ;;  %v1095_v11 = vld [vmem:[#allocation5 + $0x90] sm:$0xff]   ;;  %v1096_v12 = vld [vmem:[#allocation5 + $0x58] sm:$0xff]   ;;  %v1100_v16 = vld [vmem:[#allocation5 + $0x60] sm:$0xff]   ;;  %p1231_p12 = scmp.ne.s32.totalorder %s749_s12, %s1230_s13  ;;  %p1236_p0 = scmp.lt.s32.totalorder %s1230_s13, %s1230_s13 }
  0x5f   :  { %823 = vmatprep.subr.bf16.mxu1 %v1089_v5  ;;  %v1097_v13 = vld [vmem:[#allocation5 + $0xd8] sm:$0xff]   ;;  %v1101_v17 = vld [vmem:[#allocation5 + $0xe0] sm:$0xff]   ;;  %v1104_v20 = vld [vmem:[#allocation5 + $0x68] sm:$0xff]  }
  0x60   :  { %v1098_v14 = vld [vmem:[#allocation5 + $0x18] sm:$0xff]   ;;  %v1102_v18 = vld [vmem:[#allocation5 + $0x20] sm:$0xff]   ;;  %v1105_v21 = vld [vmem:[#allocation5 + $0xe8] sm:$0xff]   ;;  %p1237_p1 = por %p1236_p0, %p1235_p13 }
  0x61   :  { %802 = vmatpush3.bf16.msra.mxu0 %v1090_v6  ;;  %v1099_v15 = vld [vmem:[#allocation5 + $0x98] sm:$0xff]   ;;  %v1103_v19 = vld [vmem:[#allocation5 + $0xa0] sm:$0xff]   ;;  %v1106_v22 = vld [vmem:[#allocation5 + $0x28] sm:$0xff]  }
  0x62   :  { %824 = vmatpush3.bf16.msra.mxu1 %v1091_v7  ;;  %803 = vmatprep.subr.bf16.mxu0 %v1092_v8  ;;  %v1107_v23 = vld [vmem:[#allocation5 + $0xa8] sm:$0xff]   ;;  %v1108_v24 = vld [vmem:[#allocation5 + $0x70] sm:$0xff]   ;;  %v1112_v28 = vld [vmem:[#allocation5 + $0x78] sm:$0xff]   ;;  %p1238_p2 = pnand %p1237_p1, %p1231_p12 }
  0x63   :  { %825 = vmatprep.subr.bf16.mxu1 %v1093_v9  ;;  %v1109_v25 = vld [vmem:[#allocation5 + $0xf0] sm:$0xff]   ;;  %v1113_v29 = vld [vmem:[#allocation5 + $0xf8] sm:$0xff]   ;;  %v460_v34 = vld [vmem:[#allocation7] sm:$0xff] }
  0x64   :  { %v1110_v26 = vld [vmem:[#allocation5 + $0x30] sm:$0xff]   ;;  %v1114_v30 = vld [vmem:[#allocation5 + $0x38] sm:$0xff]   ;;  %v461_v39 = vld [vmem:[#allocation7 + $0x8] sm:$0xff] }
  0x65   :  { %804 = vmatpush3.bf16.msra.mxu0 %v1094_v10  ;;  %v1111_v27 = vld [vmem:[#allocation5 + $0xb0] sm:$0xff]   ;;  %v1115_v31 = vld [vmem:[#allocation5 + $0xb8] sm:$0xff]   ;;  %v1000_v41 = vpack.c.bf16 %v461_v39, %v460_v34  ;;  %v464_v45 = vld [vmem:[#allocation7 + $0x20] sm:$0xff] }
  0x66   :  { %826 = vmatpush3.bf16.msra.mxu1 %v1095_v11  ;;  %805 = vmatprep.subr.bf16.mxu0 %v1096_v12  ;;  %v100_v32 = vld [vmem:[#allocation2] sm:$0xff]  ;;  %v101_v33 = vld [vmem:[#allocation2 + $0x8] sm:$0xff]  ;;  %v465_v46 = vld [vmem:[#allocation7 + $0x28] sm:$0xff] }
  0x67   :  { %827 = vmatprep.subr.bf16.mxu1 %v1097_v13  ;;  %v760_v35 = vcombine.low %v100_v32, %v100_v32  ;;  %v761_v36 = vcombine.high %v100_v32, %v100_v32  ;;  %v762_v37 = vcombine.low %v101_v33, %v101_v33  ;;  %v763_v38 = vcombine.high %v101_v33, %v101_v33  ;;  %v462_v42 = vld [vmem:[#allocation7 + $0x10] sm:$0xff]  ;;  %v463_v43 = vld [vmem:[#allocation7 + $0x18] sm:$0xff]  ;;  %v468_v51 = vld [vmem:[#allocation7 + $0x40] sm:$0xff] }
  0x68   :  { %v1003_v44 = vpack.c.bf16 %v463_v43, %v462_v42  ;;  %v1006_v47 = vpack.c.bf16 %v465_v46, %v464_v45  ;;  %v466_v48 = vld [vmem:[#allocation7 + $0x30] sm:$0xff]  ;;  %v467_v49 = vld [vmem:[#allocation7 + $0x38] sm:$0xff]  ;;  %v469_v52 = vld [vmem:[#allocation7 + $0x48] sm:$0xff] }
  0x69   :  { %806 = vmatpush3.bf16.msra.mxu0 %v1098_v14  ;;  %411 = vmatprep.mubr.bf16.mxu0 %v761_v36  ;;  %v1009_v50 = vpack.c.bf16 %v467_v49, %v466_v48  ;;  %v1012_v53 = vpack.c.bf16 %v469_v52, %v468_v51  ;;  %v470_v54 = vld [vmem:[#allocation7 + $0x50] sm:$0xff]  ;;  %v471_v55 = vld [vmem:[#allocation7 + $0x58] sm:$0xff]  ;;  %v472_v57 = vld [vmem:[#allocation7 + $0x60] sm:$0xff] }
  0x6a   :  { %828 = vmatpush3.bf16.msra.mxu1 %v1099_v15  ;;  %807 = vmatprep.subr.bf16.mxu0 %v1100_v16  ;;  %v1015_v56 = vpack.c.bf16 %v471_v55, %v470_v54  ;;  %v473_v58 = vld [vmem:[#allocation7 + $0x68] sm:$0xff]  ;;  %v474_v60 = vld [vmem:[#allocation7 + $0x70] sm:$0xff]  ;;  %v475_v61 = vld [vmem:[#allocation7 + $0x78] sm:$0xff] }
  0x6b   :  { %829 = vmatprep.subr.bf16.mxu1 %v1101_v17  ;;  %451 = vmatprep.mubr.bf16.mxu1 %v763_v38  ;;  %v1018_v59 = vpack.c.bf16 %v473_v58, %v472_v57  ;;  %v1021_v62 = vpack.c.bf16 %v475_v61, %v474_v60  ;;  %v554_v0 = vld [vmem:[#allocation8] sm:$0xff]  ;;  %v555_v1 = vld [vmem:[#allocation8 + $0x8] sm:$0xff]  ;;  %v556_v2 = vld [vmem:[#allocation8 + $0x10] sm:$0xff] }
  0x6c   :  { %v1024_v3 = vpack.c.bf16 %v555_v1, %v554_v0  ;;  %v557_v4 = vld [vmem:[#allocation8 + $0x18] sm:$0xff]  ;;  %v558_v6 = vld [vmem:[#allocation8 + $0x20] sm:$0xff]  ;;  %v559_v7 = vld [vmem:[#allocation8 + $0x28] sm:$0xff] }
  0x6d   :  { %808 = vmatpush3.bf16.msra.mxu0 %v1102_v18  ;;  %v1027_v5 = vpack.c.bf16 %v557_v4, %v556_v2  ;;  %v1030_v8 = vpack.c.bf16 %v559_v7, %v558_v6  ;;  %v560_v9 = vld [vmem:[#allocation8 + $0x30] sm:$0xff]  ;;  %v561_v10 = vld [vmem:[#allocation8 + $0x38] sm:$0xff]  ;;  %v562_v12 = vld [vmem:[#allocation8 + $0x40] sm:$0xff] }
  0x6e   :  { %830 = vmatpush3.bf16.msra.mxu1 %v1103_v19  ;;  %809 = vmatprep.subr.bf16.mxu0 %v1104_v20  ;;  %v1033_v11 = vpack.c.bf16 %v561_v10, %v560_v9  ;;  %v563_v13 = vld [vmem:[#allocation8 + $0x48] sm:$0xff]  ;;  %v564_v15 = vld [vmem:[#allocation8 + $0x50] sm:$0xff]  ;;  %v565_v16 = vld [vmem:[#allocation8 + $0x58] sm:$0xff] }
  0x6f   :  { %831 = vmatprep.subr.bf16.mxu1 %v1105_v21  ;;  %v1036_v14 = vpack.c.bf16 %v563_v13, %v562_v12  ;;  %v1039_v17 = vpack.c.bf16 %v565_v16, %v564_v15  ;;  %v566_v18 = vld [vmem:[#allocation8 + $0x60] sm:$0xff]  ;;  %v567_v19 = vld [vmem:[#allocation8 + $0x68] sm:$0xff]  ;;  %v569_v36 = vld [vmem:[#allocation8 + $0x78] sm:$0xff] }
  0x70   :  { %v1042_v20 = vpack.c.bf16 %v567_v19, %v566_v18  ;;  %v648_v38 = vld [vmem:[#allocation10] sm:$0xff]  ;;  %v649_v39 = vld [vmem:[#allocation10 + $0x8] sm:$0xff]  ;;  %v651_v43 = vld [vmem:[#allocation10 + $0x18] sm:$0xff] }
  0x71   :  { %810 = vmatpush3.bf16.msra.mxu0 %v1106_v22  ;;  %v1048_v42 = vpack.c.bf16 %v649_v39, %v648_v38  ;;  %v652_v45 = vld [vmem:[#allocation10 + $0x20] sm:$0xff]  ;;  %v653_v46 = vld [vmem:[#allocation10 + $0x28] sm:$0xff]  ;;  %v654_v48 = vld [vmem:[#allocation10 + $0x30] sm:$0xff] }
  0x72   :  { %832 = vmatpush3.bf16.msra.mxu1 %v1107_v23  ;;  %811 = vmatprep.subr.bf16.mxu0 %v1108_v24  ;;  %v759_v23 = vld [vmem:[%s1445_s2] ss:$0 sm:$0xff]  ;;  %v655_v49 = vld [vmem:[#allocation10 + $0x38] sm:$0xff]  ;;  %v656_v51 = vld [vmem:[#allocation10 + $0x40] sm:$0xff] }
  0x73   :  { %833 = vmatprep.subr.bf16.mxu1 %v1109_v25  ;;  %v657_v52 = vld [vmem:[#allocation10 + $0x48] sm:$0xff]  ;;  %v658_v54 = vld [vmem:[#allocation10 + $0x50] sm:$0xff]  ;;  %v659_v55 = vld [vmem:[#allocation10 + $0x58] sm:$0xff] }
  0x74   :  { %v660_v57 = vld [vmem:[#allocation10 + $0x60] sm:$0xff]  ;;  %v661_v58 = vld [vmem:[#allocation10 + $0x68] sm:$0xff]  ;;  %v796_v60 = vld [vmem:[%s1447_s4] ss:$0 sm:$0xff] }
  0x75   :  { %812 = vmatpush3.bf16.msra.mxu0 %v1110_v26  ;;  %v662_v1 = vld [vmem:[#allocation10 + $0x70] sm:$0xff]  ;;  %v663_v2 = vld [vmem:[#allocation10 + $0x78] sm:$0xff] }
  0x76   :  { %834 = vmatpush3.bf16.msra.mxu1 %v1111_v27  ;;  %813 = vmatprep.subr.bf16.mxu0 %v1112_v28  ;;  %v797_v4 = vld [vmem:[%s1449_s6] ss:$0 sm:$0xff] }
  0x77   :  { %835 = vmatprep.subr.bf16.mxu1 %v1113_v29 }
  0x79   :  { %814 = vmatpush3.bf16.msra.mxu0 %v1114_v30 }
  0x7a   :  { %836 = vmatpush3.bf16.msra.mxu1 %v1115_v31  ;;  %999 = vmatprep.subr.bf16.mxu0 %v1269_v40 }
  0x7b   :  { %1023 = vmatprep.subr.bf16.mxu1 %v1269_v40 }
  0x7c   :  { %412 = vmatmul.mubr.bf16.vlgmr.msra.gmra.mrb[0].mxu0 %v760_v35  ;;  %v568_v35 = vld [vmem:[#allocation8 + $0x70] sm:$0xff] }
  0x7d   :  { %452 = vmatmul.mubr.bf16.vlgmr.msra.gmra.mrb[0].mxu1 %v762_v37  ;;  %1001 = vmatpush3.bf16.msra.mxu0 %v1000_v41  ;;  %v1045_v37 = vpack.c.bf16 %v569_v36, %v568_v35  ;;  %v650_v41 = vld [vmem:[#allocation10 + $0x10] sm:$0xff] }
  0x7e   :  { %1002 = vmatprep.subr.bf16.mxu0 %v1269_v40  ;;  %926 = vmatprep.mubr.msk.f32.mxu0 %vm1270_vm0, %v1271_v63 }
  0x7f   :  { %961 = vmatprep.mubr.msk.f32.mxu1 %vm1270_vm0, %v1271_v63  ;;  %1025 = vmatpush3.bf16.msra.mxu1 %v1024_v3  ;;  %v1069_v3 = vpack.c.bf16 %v663_v2, %v662_v1 }
  0x80   :  { %1026 = vmatprep.subr.bf16.mxu1 %v1269_v40 }
  0x81   :  { %1004 = vmatpush3.bf16.msra.mxu0 %v1003_v44  ;;  %v1051_v44 = vpack.c.bf16 %v651_v43, %v650_v41 }
  0x82   :  { %1005 = vmatprep.subr.bf16.mxu0 %v1269_v40 }
  0x83   :  { %1028 = vmatpush3.bf16.msra.mxu1 %v1027_v5 }
  0x84   :  { %1029 = vmatprep.subr.bf16.mxu1 %v1269_v40 }
  0x85   :  { %1007 = vmatpush3.bf16.msra.mxu0 %v1006_v47  ;;  %v1054_v47 = vpack.c.bf16 %v653_v46, %v652_v45 }
  0x86   :  { %1008 = vmatprep.subr.bf16.mxu0 %v1269_v40 }
  0x87   :  { %1031 = vmatpush3.bf16.msra.mxu1 %v1030_v8  ;;  %v798_v8 = vld [vmem:[%s1451_s8] ss:$0 sm:$0xff] }
  0x88   :  { %1032 = vmatprep.subr.bf16.mxu1 %v1269_v40 }
  0x89   :  { %1010 = vmatpush3.bf16.msra.mxu0 %v1009_v50  ;;  %v1057_v50 = vpack.c.bf16 %v655_v49, %v654_v48 }
  0x8a   :  { %1011 = vmatprep.subr.bf16.mxu0 %v1269_v40 }
  0x8b   :  { %1034 = vmatpush3.bf16.msra.mxu1 %v1033_v11 }
  0x8c   :  { %1035 = vmatprep.subr.bf16.mxu1 %v1269_v40 }
  0x8d   :  { %1013 = vmatpush3.bf16.msra.mxu0 %v1012_v53  ;;  %v1060_v53 = vpack.c.bf16 %v657_v52, %v656_v51 }
  0x8e   :  { %1014 = vmatprep.subr.bf16.mxu0 %v1269_v40 }
  0x8f   :  { %1037 = vmatpush3.bf16.msra.mxu1 %v1036_v14 }
  0x90   :  { %1038 = vmatprep.subr.bf16.mxu1 %v1269_v40 }
  0x91   :  { %1016 = vmatpush3.bf16.msra.mxu0 %v1015_v56  ;;  %v1063_v56 = vpack.c.bf16 %v659_v55, %v658_v54 }
  0x92   :  { %1017 = vmatprep.subr.bf16.mxu0 %v1269_v40 }
  0x93   :  { %1040 = vmatpush3.bf16.msra.mxu1 %v1039_v17 }
  0x94   :  { %1041 = vmatprep.subr.bf16.mxu1 %v1269_v40 }
  0x95   :  { %1019 = vmatpush3.bf16.msra.mxu0 %v1018_v59  ;;  %v1066_v59 = vpack.c.bf16 %v661_v58, %v660_v57 }
  0x96   :  { %1020 = vmatprep.subr.bf16.mxu0 %v1269_v40 }
  0x97   :  { %1043 = vmatpush3.bf16.msra.mxu1 %v1042_v20 }
  0x98   :  { %1044 = vmatprep.subr.bf16.mxu1 %v1269_v40 }
  0x99   :  { %1022 = vmatpush3.bf16.msra.mxu0 %v1021_v62 }
  0x9a   :  { %1047 = vmatprep.subr.bf16.mxu0 %v1269_v40 }
  0x9b   :  { %1046 = vmatpush3.bf16.msra.mxu1 %v1045_v37 }
 0x14f   :  { %v815_v21 = vpop.f32.mrb[0].mxu0 }
 0x150   :  { %v837_v22 = vpop.f32.mrb[0].mxu1  ;;  %v816_v24 = vpop.f32.mrb[1].mxu0 }
 0x151   :  { %v838_v25 = vpop.f32.mrb[1].mxu1  ;;  %v817_v26 = vadd.f32 %v816_v24, %v815_v21  ;;  %v818_v28 = vpop.f32.mrb[2].mxu0 }
 0x152   :  { %v839_v27 = vadd.f32 %v838_v25, %v837_v22  ;;  %v840_v29 = vpop.f32.mrb[2].mxu1  ;;  %v819_v30 = vpop.f32.mrb[3].mxu0 }
 0x153   :  { %v841_v31 = vpop.f32.mrb[3].mxu1  ;;  %v414_v32 = vadd.f32 %v817_v26, %v759_v23 }
 0x155   :  { %v454_v33 = vadd.f32 %v839_v27, %v414_v32 }
 0x157   :  { %v459_v34 = vmax.f32 %v454_v33, 0.0 }
 0x159   :  { %927 = vmatmul.mubr.f32.vlgmr.msra.gmra.mrb[4].mxu0 %v459_v34 }
 0x15a   :  { %996 = vmatprep.mubr.msk.f32.mxu0 %vm1270_vm0, %v1271_v63  ;;  %1049 = vmatpush3.bf16.msra.mxu0 %v1048_v42 }
 0x15b   :  { %1050 = vmatprep.subr.bf16.mxu0 %v1269_v40 }
 0x15e   :  { %1052 = vmatpush3.bf16.msra.mxu0 %v1051_v44 }
 0x15f   :  { %1053 = vmatprep.subr.bf16.mxu0 %v1269_v40 }
 0x162   :  { %1055 = vmatpush3.bf16.msra.mxu0 %v1054_v47 }
 0x163   :  { %1056 = vmatprep.subr.bf16.mxu0 %v1269_v40 }
 0x166   :  { %1058 = vmatpush3.bf16.msra.mxu0 %v1057_v50 }
 0x167   :  { %1059 = vmatprep.subr.bf16.mxu0 %v1269_v40 }
 0x16a   :  { %1061 = vmatpush3.bf16.msra.mxu0 %v1060_v53 }
 0x16b   :  { %1062 = vmatprep.subr.bf16.mxu0 %v1269_v40 }
 0x16e   :  { %1064 = vmatpush3.bf16.msra.mxu0 %v1063_v56 }
 0x16f   :  { %1065 = vmatprep.subr.bf16.mxu0 %v1269_v40 }
 0x172   :  { %1067 = vmatpush3.bf16.msra.mxu0 %v1066_v59 }
 0x173   :  { %1068 = vmatprep.subr.bf16.mxu0 %v1269_v40 }
 0x176   :  { %1070 = vmatpush3.bf16.msra.mxu0 %v1069_v3 }
 0x22c   :  { %v549_v61 = vpop.f32.mrb[4].mxu0 }
 0x22d   :  { %v550_v62 = vadd.f32 %v796_v60, %v549_v61  ;;  %v928_v63 = vpop.f32.mrb[5].mxu0 }
 0x22f   :  { %v553_v0 = vmax.f32 %v550_v62, 0.0 }
 0x231   :  { %962 = vmatmul.mubr.f32.vlgmr.msra.gmra.mrb[4].mxu1 %v553_v0 }
 0x304   :  { %v643_v5 = vpop.f32.mrb[4].mxu1 }
 0x305   :  { %v644_v6 = vadd.f32 %v797_v4, %v643_v5  ;;  %v963_v40 = vpop.f32.mrb[5].mxu1 }
 0x307   :  { %v647_v7 = vmax.f32 %v644_v6, 0.0 }
 0x309   :  { %997 = vmatmul.mubr.f32.vlgmr.msra.gmra.mrb[6].mxu0 %v647_v7 }
 0x3dc   :  { %v737_v9 = vpop.f32.mrb[6].mxu0 }
 0x3dd   :  { %v738_v10 = vadd.f32 %v798_v8, %v737_v9  ;;  %v998_v11 = vpop.f32.mrb[7].mxu0 }
 0x3df   :  { %741 = vst [vmem:[#allocation11] sm:$0xff] %v738_v10 }
 0x3e0   :  { %1241 = shalt.err (!%p1238_p2)
}
 0x3e1   :  { %s1242_s15 = scalar_lea.hbm %s1452_s9, 128 }
 0x3e2   :  { %p1243_p3 = scmp.ne.s32.totalorder %s1452_s9, %s1242_s15  ;;  %p1246_p4 = scmp.lt.u32.totalorder %s1242_s15, %s1452_s9 }
 0x3e4   :  { %p1248_p5 = pnand %p1246_p4, %p1243_p3 }
 0x3e6   :  { %1251 = shalt.err (!%p1248_p5)
}
 0x3e7   :  { %751 = dma.vmem_to_hbm [thread:$0]  %s749_s12, 128, %s1452_s9, [#allocation4]  }
 0x3e8   :  { %1258 = dma.done.wait [#allocation4], 128  }
 0x3e9   :  { %1259 = vsyncadd [#allocation4], 4294967168 }
 0x3ea   :  { %755 = vsyncpa [#allocation3], 1 }
 0x3eb   :  { %756 = vsyncpa [#allocation6], 1 }
 0x3ec   :  { %757 = vsyncpa [#allocation9], 1 }
 0x3ed   :  { %758 = vsyncpa [#allocation4], 1 }

</bundles_post_ra>
